<compile_context>
chip_gen: v5e
topology: v5e:2x2
jax: 0.10.0
libtpu: 0.0.40
codegen_flags: <defaults>
</compile_context>

<pallas_src>
import functools

import jax
import jax.numpy as jnp
from jax.experimental import pallas as pl
from jax.experimental.pallas import tpu as pltpu


def _round_up(x, m):
    return ((x + m - 1) // m) * m


def _pool_linear_kernel(x_ref, w_ref, b_ref, o_ref, acc_ref, *,
                        seq_len, seq_tile, mask_seq, inv_seq_len):
    """Accumulate sum over the sequence axis; mean-scale + matmul + bias at the last step."""
    s = pl.program_id(1)
    last = pl.num_programs(1) - 1

    @pl.when(s == 0)
    def _init():
        acc_ref[...] = jnp.zeros_like(acc_ref)

    if mask_seq:
        # Only the final (partial) sequence tile pays for iota/cmp/select; every other
        # step is the bare reduce-add hot loop.
        @pl.when(s != last)
        def _accumulate_full():
            acc_ref[...] += jnp.sum(x_ref[...], axis=1, dtype=jnp.float32)

        @pl.when(s == last)
        def _accumulate_masked():
            x = x_ref[...]                                        # (TB, TS, H)
            row = jax.lax.broadcasted_iota(jnp.int32, x.shape, 1)
            valid = row < (seq_len - s * seq_tile)
            x = jnp.where(valid, x, jnp.zeros_like(x))
            acc_ref[...] += jnp.sum(x, axis=1, dtype=jnp.float32)
    else:
        acc_ref[...] += jnp.sum(x_ref[...], axis=1, dtype=jnp.float32)

    @pl.when(s == last)
    def _finalize():
        # Exact mean in f32 (one (TB, H) VPU multiply, once per batch tile), then
        # head_mm on the MXU with f32 accumulation.
        pooled = acc_ref[...] * jnp.float32(inv_seq_len)
        y = jnp.dot(pooled, w_ref[...], preferred_element_type=jnp.float32)
        y = y + b_ref[...]                                        # (1, Cp) bias broadcast
        o_ref[...] = y.astype(o_ref.dtype)


def prepare_head_params(w, b):
    """Pad head_mm params once (lane-dense Cp = multiple of 128). Cache and reuse.

    w: (H, C)  head_mm weight, pre-transposed from PyTorch's (C, H)
    b: (C,)    head_mm bias
    returns: (w_p (H, Cp), b_p (1, Cp) f32, C)
    """
    H, C = w.shape
    Cp = max(128, _round_up(C, 128))
    w_p = jnp.zeros((H, Cp), w.dtype).at[:, :C].set(w)
    b_p = jnp.zeros((1, Cp), jnp.float32).at[0, :C].set(b.astype(jnp.float32))
    return w_p, b_p, C


def early_fusion_head_mm(x, w_p, b_p, num_classes, *, batch_tile=None, seq_tile=None):
    """Fused mean-pool (dim=1) + Linear head.

    x:   (B, S, H)  backbone `last_hidden_state` (f32 or bf16)
    w_p: (H, Cp)    padded head weight from prepare_head_params
    b_p: (1, Cp)    padded f32 bias from prepare_head_params
    returns: (B, num_classes) in x.dtype
    """
    B, S, H = x.shape
    Hw, Cp = w_p.shape
    assert Hw == H, "weight must be (H, Cp)"
    assert Cp % 128 == 0 and Cp >= num_classes

    # --- per-generation VMEM budget (v5e/v6e: 128 MiB physical; v7x: 64 MiB) ---
    try:
        phys_vmem = int(pltpu.get_tpu_info().vmem_capacity_bytes)
    except Exception:
        phys_vmem = 64 << 20                        # conservative fallback (v7x-sized)
    if phys_vmem >= (128 << 20):                    # v5e / v6e
        vmem_limit_bytes = 64 << 20
        stream_budget = 40 << 20
    else:                                           # v7x
        vmem_limit_bytes = 44 << 20
        stream_budget = 24 << 20

    # --- tile sizing: small TB (multiple of 8, grid[0] >= 2 when B >= 16), big TS ---
    itemsize = jnp.dtype(x.dtype).itemsize
    sublane = {4: 8, 2: 16, 1: 32}.get(itemsize, 8)   # dtype-aware sublane packing
    if batch_tile is None:
        if B <= 8:
            batch_tile = B
            # TODO(synk): for tiny B on v7x, megacore needs a 2-way core split over the
            # sequence axis (per-core partial sums); not implemented here.
        else:
            batch_tile = min(32, max(8, ((B // 2) // 8) * 8))
    TB = min(batch_tile, B)

    if seq_tile is None:
        max_ts = stream_budget // (2 * TB * H * itemsize)   # double-buffered x stream
        max_ts = max(sublane, (max_ts // sublane) * sublane)
        seq_tile = S if S <= max_ts else max_ts
    TS = min(seq_tile, S)
    if TS < S and TS % sublane != 0:                # keep vregs dense / DMAs unmasked
        TS = max(sublane, (TS // sublane) * sublane)
    mask_seq = (S % TS) != 0

    grid = (pl.cdiv(B, TB), pl.cdiv(S, TS))

    kernel = functools.partial(_pool_linear_kernel,
                               seq_len=S, seq_tile=TS, mask_seq=mask_seq,
                               inv_seq_len=1.0 / float(S))

    # Advisory cost hint: this op is HBM-bandwidth bound (streams all of x once).
    bytes_accessed = (B * S * H * itemsize
                      + H * Cp * jnp.dtype(w_p.dtype).itemsize
                      + B * Cp * itemsize)
    flops = B * S * H + 2 * B * H * Cp

    out_p = pl.pallas_call(
        kernel,
        out_shape=jax.ShapeDtypeStruct((B, Cp), x.dtype),
        grid_spec=pltpu.PrefetchScalarGridSpec(
            num_scalar_prefetch=0,
            grid=grid,
            in_specs=[
                # Streamed x. If an xprof trace shows exposed DMA gaps on v7x, add
                # pipeline_mode=pl.Buffered(3) here.
                pl.BlockSpec((TB, TS, H), lambda bi, si: (bi, si, 0)),
                pl.BlockSpec((H, Cp), lambda bi, si: (0, 0)),            # resident W
                pl.BlockSpec((1, Cp), lambda bi, si: (0, 0)),            # resident bias
            ],
            out_specs=pl.BlockSpec((TB, Cp), lambda bi, si: (bi, 0)),
            scratch_shapes=[pltpu.VMEM((TB, H), jnp.float32)],           # sum accumulator
        ),
        compiler_params=pltpu.CompilerParams(
            dimension_semantics=("parallel", "arbitrary"),
            vmem_limit_bytes=vmem_limit_bytes),
        cost_estimate=pl.CostEstimate(
            flops=flops, transcendentals=0, bytes_accessed=bytes_accessed),
    )(x, w_p, b_p)

    return out_p[:, :num_classes]


def init_head_params(key, hidden_dim, num_classes):
    """Deterministic PyTorch-style Linear init: U(-1/sqrt(H), 1/sqrt(H))."""
    kw, kb = jax.random.split(key)
    bound = 1.0 / jnp.sqrt(jnp.float32(hidden_dim))
    # Stored as (H, C): transpose of PyTorch's (C, H) weight.
    w = jax.random.uniform(kw, (hidden_dim, num_classes), jnp.float32,
                           minval=-bound, maxval=bound)
    b = jax.random.uniform(kb, (num_classes,), jnp.float32,
                           minval=-bound, maxval=bound)
    return w, b


if __name__ == "__main__":
    # TODO(synk): self.model (the multimodal backbone producing last_hidden_state)
    # is an external module and is not translated; we feed its output directly.
    # Dropout(p=0.1) is identity at inference and is omitted.
    key = jax.random.PRNGKey(0)

    # --- case 1: small shapes implied by the module (B, S, H, C) ---
    B, S, H, C = 2, 8, 32, 4
    kx, kp, k2 = jax.random.split(key, 3)
    x = jax.random.normal(kx, (B, S, H), jnp.float32)    # backbone last_hidden_state
    w, b = init_head_params(kp, H, C)
    w_p, b_p, _ = prepare_head_params(w, b)              # pad once, reuse across calls

    out = early_fusion_head_mm(x, w_p, b_p, C)
    out = jax.block_until_ready(out)
    ref = jnp.mean(x, axis=1) @ w + b
    assert out.shape == (B, C)
    assert jnp.allclose(out, ref, atol=1e-5, rtol=1e-5)

    # --- case 2: non-divisible sequence (exercises the gated partial-tile mask) ---
    B2, S2 = 4, 20
    x2 = jax.random.normal(k2, (B2, S2, H), jnp.float32)
    out2 = early_fusion_head_mm(x2, w_p, b_p, C, seq_tile=8)   # grid seq steps = 3, last partial
    out2 = jax.block_until_ready(out2)
    ref2 = jnp.mean(x2, axis=1) @ w + b
    assert out2.shape == (B2, C)
    assert jnp.allclose(out2, ref2, atol=1e-5, rtol=1e-5)

    print("KERNEL_OK")
</pallas_src>

<mosaic_0001>
module attributes {stable_mosaic.version = 11 : i64} {
  func.func @_pool_linear_kernel(%arg0: i32, %arg1: i32, %arg2: memref<2x8x32xf32, #tpu.memory_space<vmem>>, %arg3: memref<32x128xf32, #tpu.memory_space<vmem>>, %arg4: memref<1x128xf32, #tpu.memory_space<vmem>>, %arg5: memref<2x128xf32, #tpu.memory_space<vmem>>, %arg6: memref<2x32xf32, #tpu.memory_space<vmem>>) attributes {dimension_semantics = [#tpu.dimension_semantics<parallel>, #tpu.dimension_semantics<arbitrary>], iteration_bounds = array<i64: 1, 1>, scalar_prefetch = 0 : i64, scratch_operands = 1 : i64, tpu.core_type = #tpu.core_type<tc>, window_params = [{transform_indices = @transform_0, window_bounds = array<i64: 2, 8, 32>}, {pipeline_mode = #tpu.pipeline_mode<synchronous>, transform_indices = @transform_1, window_bounds = array<i64: 32, 128>}, {pipeline_mode = #tpu.pipeline_mode<synchronous>, transform_indices = @transform_2, window_bounds = array<i64: 1, 128>}, {transform_indices = @transform_3, window_bounds = array<i64: 2, 128>}]} {
    %c0_i32 = arith.constant 0 : i32
    %0 = arith.cmpi eq, %arg1, %c0_i32 : i32
    %1 = arith.extui %0 : i1 to i32
    %c0_i32_0 = arith.constant 0 : i32
    %2 = arith.cmpi ne, %1, %c0_i32_0 : i32
    scf.if %2 {
      %cst_9 = arith.constant 0.000000e+00 : f32
      %11 = vector.broadcast %cst_9 : f32 to vector<2x32xf32>
      %c0_10 = arith.constant 0 : index
      %c0_11 = arith.constant 0 : index
      %12 = vector.load %arg6[%c0_10, %c0_11] : memref<2x32xf32, #tpu.memory_space<vmem>>, vector<2x32xf32>
      tpu.vector_store %arg6[%c0_10, %c0_11], %11 {strides = array<i32>} : memref<2x32xf32, #tpu.memory_space<vmem>>, vector<2x32xf32>,
    } else {
    }
    %c0 = arith.constant 0 : index
    %c0_1 = arith.constant 0 : index
    %3 = vector.load %arg6[%c0, %c0_1] : memref<2x32xf32, #tpu.memory_space<vmem>>, vector<2x32xf32>
    %c0_2 = arith.constant 0 : index
    %c0_3 = arith.constant 0 : index
    %c0_4 = arith.constant 0 : index
    %4 = vector.load %arg2[%c0_2, %c0_3, %c0_4] : memref<2x8x32xf32, #tpu.memory_space<vmem>>, vector<2x8x32xf32>
    %cst = arith.constant dense<0.000000e+00> : vector<2x32xf32>
    %5 = vector.multi_reduction <add>, %4, %cst [1] : vector<2x8x32xf32> to vector<2x32xf32>
    %6 = arith.addf %3, %5 : vector<2x32xf32>
    %c0_5 = arith.constant 0 : index
    %c0_6 = arith.constant 0 : index
    %7 = vector.load %arg6[%c0_5, %c0_6] : memref<2x32xf32, #tpu.memory_space<vmem>>, vector<2x32xf32>
    tpu.vector_store %arg6[%c0_5, %c0_6], %6 {strides = array<i32>} : memref<2x32xf32, #tpu.memory_space<vmem>>, vector<2x32xf32>,
    %c0_i32_7 = arith.constant 0 : i32
    %8 = arith.cmpi eq, %arg1, %c0_i32_7 : i32
    %9 = arith.extui %8 : i1 to i32
    %c0_i32_8 = arith.constant 0 : i32
    %10 = arith.cmpi ne, %9, %c0_i32_8 : i32
    scf.if %10 {
      %c0_9 = arith.constant 0 : index
      %c0_10 = arith.constant 0 : index
      %11 = vector.load %arg6[%c0_9, %c0_10] : memref<2x32xf32, #tpu.memory_space<vmem>>, vector<2x32xf32>
      %cst_11 = arith.constant 1.250000e-01 : f32
      %12 = vector.broadcast %cst_11 : f32 to vector<2x32xf32>
      %13 = arith.mulf %11, %12 : vector<2x32xf32>
      %c0_12 = arith.constant 0 : index
      %c0_13 = arith.constant 0 : index
      %14 = vector.load %arg3[%c0_12, %c0_13] : memref<32x128xf32, #tpu.memory_space<vmem>>, vector<32x128xf32>
      %cst_14 = arith.constant dense<0.000000e+00> : vector<2x128xf32>
      %15 = tpu.matmul %13, %14, %cst_14 {dimension_numbers = #tpu.dot_dimension_numbers<[1], [0], [0], [1], [0, 0, 1, 1], [], []>} : vector<2x32xf32>, vector<32x128xf32>, vector<2x128xf32> -> vector<2x128xf32>
      %c0_15 = arith.constant 0 : index
      %c0_16 = arith.constant 0 : index
      %16 = vector.load %arg4[%c0_15, %c0_16] : memref<1x128xf32, #tpu.memory_space<vmem>>, vector<1x128xf32>
      %17 = vector.broadcast %16 : vector<1x128xf32> to vector<2x128xf32>
      %18 = arith.addf %15, %17 : vector<2x128xf32>
      %c0_17 = arith.constant 0 : index
      %c0_18 = arith.constant 0 : index
      %19 = vector.load %arg5[%c0_17, %c0_18] : memref<2x128xf32, #tpu.memory_space<vmem>>, vector<2x128xf32>
      tpu.vector_store %arg5[%c0_17, %c0_18], %18 {strides = array<i32>} : memref<2x128xf32, #tpu.memory_space<vmem>>, vector<2x128xf32>,
    } else {
    }
    return
  }
  func.func @transform_0(%arg0: i32, %arg1: i32) -> (i32, i32, i32) {
    %c0_i32 = arith.constant 0 : i32
    %c0_i32_0 = arith.constant 0 : i32
    return %arg0, %arg1, %c0_i32 : i32, i32, i32
  }
  func.func @transform_1(%arg0: i32, %arg1: i32) -> (i32, i32) {
    %c0_i32 = arith.constant 0 : i32
    %c0_i32_0 = arith.constant 0 : i32
    %c0_i32_1 = arith.constant 0 : i32
    return %c0_i32, %c0_i32_0 : i32, i32
  }
  func.func @transform_2(%arg0: i32, %arg1: i32) -> (i32, i32) {
    %c0_i32 = arith.constant 0 : i32
    %c0_i32_0 = arith.constant 0 : i32
    %c0_i32_1 = arith.constant 0 : i32
    return %c0_i32, %c0_i32_0 : i32, i32
  }
  func.func @transform_3(%arg0: i32, %arg1: i32) -> (i32, i32) {
    %c0_i32 = arith.constant 0 : i32
    %c0_i32_0 = arith.constant 0 : i32
    return %arg0, %c0_i32 : i32, i32
  }
}

</mosaic_0001>

<bundles_post_ra>
// kernel: tpu_custom_call.1
= control target key start
LH: loop header
LB: loop body
LE: loop exit
PB: predicated region body
PF: predicated region fallthrough
CT: control target
= control target key end

     0   :  { %8 = vsyncpa [#allocation4], 0  ;;  %s263_s0 = inlined_call_operand.hbm [shape: f32[2,8,32], index: 0, kind: input, shape index: {}]   ;;  %s264_s1 = inlined_call_operand.hbm [shape: f32[32,128], index: 1, kind: input, shape index: {}]   ;;  %s265_s2 = inlined_call_operand.vmem [shape: f32[1,128], index: 2, kind: input, shape index: {}]   ;;  %s266_s3 = inlined_call_operand.hbm [shape: f32[2,128], index: 3, kind: output, shape index: {}]  }
   0x1   :  { %9 = vsyncpa [#allocation7], 0 }
   0x2   :  { %10 = vsyncpa [#allocation5], 0  ;;  %s15_s14 = sshll.u32 %s263_s0, 4  ;;  %s220_s15 = smov [#allocation3]   ;;  %s16_s14 = int_to_ptr.hbm [resolvable:$true] %s15_s14 }
   0x3   :  { %s17_s16 = sshll.u32 %s220_s15, 4  ;;  %s28_s19 = sshll.u32 %s264_s1, 4  ;;  %s18_s16 = int_to_ptr.vmem [resolvable:$true] %s17_s16  ;;  %s29_s19 = int_to_ptr.hbm [resolvable:$true] %s28_s19 }
   0x4   :  { %s221_s20 = smov 128   ;;  %s222_s21 = smov 8  }
   0x5   :  { %23 = dma.hbm_to_vmem [thread:$0]  %s16_s14, 256, %s18_s16, [#allocation4], %s221_s20, %s221_s20, %s222_s21  }
   0x6   :  { %s223_s22 = smov [#allocation6]  }
   0x7   :  { %s30_s23 = sshll.u32 %s223_s22, 4  ;;  %s31_s23 = int_to_ptr.vmem [resolvable:$true] %s30_s23 }
   0x8   :  { %36 = dma.hbm_to_vmem [thread:$0]  %s29_s19, 512, %s31_s23, [#allocation7], %s221_s20, %s221_s20, %s222_s21  }
   0x9   :  { %214 = dma.done.wait [#allocation4], 256  }
   0xa   :  { %215 = vsyncadd [#allocation4], 4294967040 }
   0xb   :  { %216 = dma.done.wait [#allocation7], 512  }
   0xc   :  { %217 = vsyncadd [#allocation7], 4294966784  ;;  %vm51_vm0 = vcmask 254976   ;;  %v224_v0 = vmov 0.0   ;;  %vm56_vm1 = vcmask 261120   ;;  %v87_v1 = vld [vmem:[#allocation6 + $0x18] sm:$0xff] }
   0xd   :  { %52 = vst.msk [vmem:[#allocation2] sm:$0x3] %vm51_vm0, %v224_v0  ;;  %v86_v2 = vld [vmem:[#allocation6 + $0x10] sm:$0xff]  ;;  %107 = vmatpush.msra.mxu0 %v87_v1  ;;  %v85_v4 = vld [vmem:[#allocation6 + $0x8] sm:$0xff]  ;;  %v55_v5 = vld [vmem:[#allocation3 + $0x8] sm:$0xff]  ;;  %vm73_vm2 = vcmask 1041409  }
   0xe   :  { %v54_v3 = vld [vmem:[#allocation3] sm:$0xff]  ;;  %v64_v8 = vsel %vm56_vm1, %v55_v5, 0.0  ;;  %v84_v9 = vld [vmem:[#allocation6] sm:$0xff]  ;;  %v141_v26 = vld [vmem:[%s265_s2] ss:$0 sm:$0xff]  ;;  %s225_s24 = smov [#allocation8]  }
   0xf   :  { %v57_v6 = vsel %vm56_vm1, %v54_v3, 0.0  ;;  %108 = vmatpush.msra.mxu0 %v86_v2  ;;  %v65_v10 = vrot.slane %v64_v8, 4  ;;  %s121_s25 = sshll.u32 %s225_s24, 4  ;;  %s123_s28 = sshll.u32 %s266_s3, 4  ;;  %s122_s25 = int_to_ptr.vmem [resolvable:$true] %s121_s25  ;;  %s124_s28 = int_to_ptr.hbm [resolvable:$true] %s123_s28 }
  0x10   :  { %v58_v7 = vrot.slane %v57_v6, 4 }
  0x11   :  { %109 = vmatpush.msra.mxu0 %v85_v4  ;;  %v66_v12 = vadd.f32 %v65_v10, %v64_v8 }
  0x12   :  { %v59_v11 = vadd.f32 %v58_v7, %v57_v6 }
  0x13   :  { %110 = vmatpush.msra.mxu0 %v84_v9  ;;  %v67_v14 = vrot.slane %v66_v12, 2 }
  0x14   :  { %v60_v13 = vrot.slane %v59_v11, 2  ;;  %v53_v20 = vld [vmem:[#allocation2] sm:$0x3] }
  0x15   :  { %v68_v16 = vadd.f32 %v67_v14, %v66_v12 }
  0x16   :  { %v61_v15 = vadd.f32 %v60_v13, %v59_v11 }
  0x17   :  { %v69_v18 = vrot.slane %v68_v16, 1 }
  0x18   :  { %v62_v17 = vrot.slane %v61_v15, 1 }
  0x19   :  { %v70_v21 = vadd.f32 %v69_v18, %v68_v16 }
  0x1a   :  { %v63_v19 = vadd.f32 %v62_v17, %v61_v15 }
  0x1c   :  { %v74_v22 = vsel %vm73_vm2, %v70_v21, %v63_v19 }
  0x1d   :  { %v76_v23 = vadd.f32 %v74_v22, %v53_v20 }
  0x1f   :  { %78 = vst.msk [vmem:[#allocation2] sm:$0x3] %vm51_vm0, %v76_v23 }
  0x26   :  { %v82_v24 = vld [vmem:[#allocation2] sm:$0x3] }
  0x27   :  { %v83_v25 = vmul.f32 0.125, %v82_v24 }
  0x29   :  { %134 = vmatmul.msk.f32.vlgmr.msra.gmra.mxu0 %vm56_vm1, %v83_v25 }
  0xa6   :  { %v112_v27 = vpop.f32.mrf.mxu0 }
  0xa7   :  { %v113_v28 = vadd.f32 %v141_v26, %v112_v27 }
  0xa9   :  { %115 = vst [vmem:[#allocation8] sm:$0x3] %v113_v28 }
  0xaa   :  { %126 = dma.vmem_to_hbm [thread:$0]  %s122_s25, 32, %s124_s28, [#allocation5]  }
  0xab   :  { %218 = dma.done.wait [#allocation5], 32  }
  0xac   :  { %219 = vsyncadd [#allocation5], 4294967264 }
  0xad   :  { %131 = vsyncpa [#allocation4], 1 }
  0xae   :  { %132 = vsyncpa [#allocation7], 1 }
  0xaf   :  { %133 = vsyncpa [#allocation5], 1 }

</bundles_post_ra>
